<compile_context>
chip_gen: v5e
topology: v5e:2x2
jax: 0.10.0
libtpu: 0.0.40
codegen_flags: <defaults>
</compile_context>

<pallas_src>
import functools

import jax
import jax.numpy as jnp
from jax.experimental import pallas as pl
from jax.experimental.pallas import tpu as pltpu


def decoder_kernel(xlast_ref, z_ref, wi_ref, bi_ref, wz_ref, wy_ref,
                   wcomb_ref, b0_ref, brec_ref, wd_ref, bd_ref, out_ref,
                   *, ph, concat_dim, out_dim):
    """Runs the full ph-step recurrence for one batch block, fully unrolled."""
    C = concat_dim
    f32 = jnp.float32
    bb = out_ref.shape[0]                                      # static block rows

    # ---- one-time work (off the per-step serial chain) ----------------------
    # y_0 = init_pred(x[:, -1, :])
    y = (jnp.dot(xlast_ref[...], wi_ref[...], preferred_element_type=f32)
         + bi_ref[...])                                        # (bb, out_dim)
    # time-invariant gate contribution from the latent z
    pre_z = jnp.dot(z_ref[...], wz_ref[...],
                    preferred_element_type=f32)                # (bb, 4C)
    pre0 = pre_z + b0_ref[...]                                 # t = 0 bias
    pre_rec = pre_z + brec_ref[...]                            # t >= 1 (b_d folded)

    wcomb = wcomb_ref[...]                                     # (C, 4C)
    wd = wd_ref[...]                                           # (C, out_dim)
    bd_b = jnp.broadcast_to(bd_ref[...], (bb, out_dim))        # hoisted broadcast

    # ---- t = 0 peeled: h = c = 0 -> no f*c; y_0 feedback uses W_ih_y^T ------
    gates = pre0 + jnp.dot(y, wy_ref[...], preferred_element_type=f32)  # (bb,4C)
    sig = jax.nn.sigmoid(gates)          # activate full slab once, slice after
    th = jnp.tanh(gates)
    c = sig[:, 0 * C:1 * C] * th[:, 2 * C:3 * C]               # i * g
    h = sig[:, 3 * C:4 * C] * jnp.tanh(c)                      # o * tanh(c)
    y = jnp.dot(h, wd, preferred_element_type=f32) + bd_b      # off-chain output
    out_ref[:, 0:out_dim] = y                                  # static-offset store

    # ---- t = 1 .. ph-1: ONE recurrent matmul per step on the serial chain ---
    for t in range(1, ph):
        gates = pre_rec + jnp.dot(h, wcomb, preferred_element_type=f32)
        sig = jax.nn.sigmoid(gates)
        th = jnp.tanh(gates)
        c = sig[:, 1 * C:2 * C] * c + sig[:, 0 * C:1 * C] * th[:, 2 * C:3 * C]
        h = sig[:, 3 * C:4 * C] * jnp.tanh(c)
        # output projection + store no longer feed the recurrence (folded into
        # wcomb), so the scheduler hides them under the next step's matmul.
        y = jnp.dot(h, wd, preferred_element_type=f32) + bd_b
        out_ref[:, t * out_dim:(t + 1) * out_dim] = y


def decoder_forward(x, z, params, ph, batch_block=None):
    """Pallas equivalent of Decoder_concat_output_latent.forward(x, z)."""
    bs = z.shape[0]
    z2 = z.reshape(bs, -1).astype(jnp.float32)                 # (bs, latent)
    latent_dim = z2.shape[1]
    out_dim = params["w_d"].shape[0]
    C = params["w_hh"].shape[1]                                # concat_dim
    assert C == latent_dim + out_dim, "concat_dim must be latent_dim + output_dim"
    input_dim = params["w_init"].shape[1]

    x_last = x[:, -1, :].astype(jnp.float32)                   # (bs, input_dim)

    # ---- pad batch to a multiple of 8 rows (full sublane utilization) -------
    bs_pad = ((bs + 7) // 8) * 8
    if bs_pad != bs:
        pad = bs_pad - bs
        x_last = jnp.concatenate(
            [x_last, jnp.zeros((pad, input_dim), jnp.float32)], axis=0)
        z2 = jnp.concatenate(
            [z2, jnp.zeros((pad, latent_dim), jnp.float32)], axis=0)

    # ---- parameter prep (pre-transposed; dense feedback folded) -------------
    wi_t = jnp.asarray(params["w_init"], jnp.float32).T        # (input_dim, out)
    bi = jnp.asarray(params["b_init"], jnp.float32).reshape(1, out_dim)
    w_ih = jnp.asarray(params["w_ih"], jnp.float32)
    wz_t = w_ih[:, :latent_dim].T                              # (latent, 4C)
    wy_t = w_ih[:, latent_dim:].T                              # (out, 4C)
    whh_t = jnp.asarray(params["w_hh"], jnp.float32).T         # (C, 4C)
    wd_t = jnp.asarray(params["w_d"], jnp.float32).T           # (C, out)
    bd_vec = jnp.asarray(params["b_d"], jnp.float32)           # (out,)
    b0 = (jnp.asarray(params["b_ih"], jnp.float32)
          + jnp.asarray(params["b_hh"], jnp.float32)).reshape(1, 4 * C)
    # fold the dense feedback: y_{t-1}@Wy^T == h_{t-1}@(Wd^T@Wy^T) + b_d@Wy^T
    wcomb = whh_t + wd_t @ wy_t                                # (C, 4C)
    brec = b0 + (bd_vec @ wy_t).reshape(1, 4 * C)              # (1, 4C)
    bd = bd_vec.reshape(1, out_dim)

    # ---- batch blocking: split ONLY on v7x (2 TensorCores), bb multiple of 8
    if batch_block is None:
        dev_kind = jax.devices()[0].device_kind.lower()
        two_tc = "v7" in dev_kind                              # v5e/v6e: single TC
        if two_tc and bs_pad >= 16 and bs_pad % 16 == 0:
            batch_block = bs_pad // 2
        else:
            batch_block = bs_pad
    bb = batch_block
    assert bs_pad % bb == 0, "batch_block must divide the padded batch size"
    nb = bs_pad // bb

    kernel = functools.partial(decoder_kernel, ph=ph, concat_dim=C,
                               out_dim=out_dim)

    batched = lambda i: (i, 0)     # batch-tiled arrays
    shared = lambda i: (0, 0)      # weights / biases, same block every step

    y_flat = pl.pallas_call(
        kernel,
        out_shape=jax.ShapeDtypeStruct((bs_pad, ph * out_dim), jnp.float32),
        grid=(nb,),
        in_specs=[
            pl.BlockSpec((bb, input_dim), batched),        # x_last
            pl.BlockSpec((bb, latent_dim), batched),       # z
            pl.BlockSpec((input_dim, out_dim), shared),    # W_init^T
            pl.BlockSpec((1, out_dim), shared),            # b_init
            pl.BlockSpec((latent_dim, 4 * C), shared),     # W_ih_z^T
            pl.BlockSpec((out_dim, 4 * C), shared),        # W_ih_y^T (t=0 only)
            pl.BlockSpec((C, 4 * C), shared),              # W_comb (folded)
            pl.BlockSpec((1, 4 * C), shared),              # b_ih + b_hh
            pl.BlockSpec((1, 4 * C), shared),              # ... + b_d @ W_ih_y^T
            pl.BlockSpec((C, out_dim), shared),            # W_d^T
            pl.BlockSpec((1, out_dim), shared),            # b_d
        ],
        out_specs=pl.BlockSpec((bb, ph * out_dim), batched),
        compiler_params=pltpu.CompilerParams(
            dimension_semantics=("parallel",)),            # rows are independent
    )(x_last, z2, wi_t, bi, wz_t, wy_t, wcomb, b0, brec, wd_t, bd)

    return y_flat[:bs].reshape(bs, ph, out_dim)


def reference_forward(x, z, params, ph):
    """Pure-JAX reference matching the PyTorch module semantics."""
    bs = z.shape[0]
    z2 = z.reshape(bs, -1)
    C = params["w_hh"].shape[1]
    h = jnp.zeros((bs, C), jnp.float32)
    c = jnp.zeros((bs, C), jnp.float32)
    y = x[:, -1, :] @ params["w_init"].T + params["b_init"]
    outs = []
    for _ in range(ph):
        cat = jnp.concatenate([z2, y], axis=1)
        gates = (cat @ params["w_ih"].T + params["b_ih"]
                 + h @ params["w_hh"].T + params["b_hh"])
        i_g = jax.nn.sigmoid(gates[:, :C])
        f_g = jax.nn.sigmoid(gates[:, C:2 * C])
        g_g = jnp.tanh(gates[:, 2 * C:3 * C])
        o_g = jax.nn.sigmoid(gates[:, 3 * C:4 * C])
        c = f_g * c + i_g * g_g
        h = o_g * jnp.tanh(c)
        y = h @ params["w_d"].T + params["b_d"]
        outs.append(y)
    return jnp.stack(outs, axis=1)                             # (bs, ph, out)


def init_params(key, dp):
    """Deterministic init mimicking PyTorch's U(-1/sqrt(fan_in), 1/sqrt(fan_in))."""
    C = dp["latent_dim"] + dp["output_dim"]
    ks = jax.random.split(key, 8)

    def u(k, shape, fan_in):
        bound = 1.0 / (fan_in ** 0.5)
        return jax.random.uniform(k, shape, jnp.float32, -bound, bound)

    return {
        "w_ih": u(ks[0], (4 * C, C), C),
        "w_hh": u(ks[1], (4 * C, C), C),
        "b_ih": u(ks[2], (4 * C,), C),
        "b_hh": u(ks[3], (4 * C,), C),
        "w_d": u(ks[4], (dp["output_dim"], C), C),
        "b_d": u(ks[5], (dp["output_dim"],), C),
        "w_init": u(ks[6], (dp["output_dim"], dp["input_dim"]), dp["input_dim"]),
        "b_init": u(ks[7], (dp["output_dim"],), dp["input_dim"]),
    }


if __name__ == "__main__":
    decoder_params = dict(ph=8, hidden_dim=32, output_dim=8,
                          latent_dim=24, input_dim=16)   # concat_dim = 32, 4C = 128
    bs, seq = 4, 10

    key = jax.random.PRNGKey(0)
    kx, kz, kp = jax.random.split(key, 3)
    x = jax.random.normal(kx, (bs, seq, decoder_params["input_dim"]), jnp.float32)
    z = jax.random.normal(kz, (bs, 1, decoder_params["latent_dim"]), jnp.float32)
    params = init_params(kp, decoder_params)

    y = decoder_forward(x, z, params, decoder_params["ph"])
    y = jax.block_until_ready(y)

    y_ref = reference_forward(x, z, params, decoder_params["ph"])
    assert y.shape == (bs, decoder_params["ph"], decoder_params["output_dim"])
    assert jnp.allclose(y, y_ref, atol=1e-4, rtol=1e-4), "mismatch vs reference"

    print("KERNEL_OK")
</pallas_src>

<mosaic_0001>
module attributes {stable_mosaic.version = 11 : i64} {
  func.func @decoder_kernel(%arg0: i32, %arg1: memref<8x16xf32, #tpu.memory_space<vmem>>, %arg2: memref<8x24xf32, #tpu.memory_space<vmem>>, %arg3: memref<16x8xf32, #tpu.memory_space<vmem>>, %arg4: memref<1x8xf32, #tpu.memory_space<vmem>>, %arg5: memref<24x128xf32, #tpu.memory_space<vmem>>, %arg6: memref<8x128xf32, #tpu.memory_space<vmem>>, %arg7: memref<32x128xf32, #tpu.memory_space<vmem>>, %arg8: memref<1x128xf32, #tpu.memory_space<vmem>>, %arg9: memref<1x128xf32, #tpu.memory_space<vmem>>, %arg10: memref<32x8xf32, #tpu.memory_space<vmem>>, %arg11: memref<1x8xf32, #tpu.memory_space<vmem>>, %arg12: memref<8x64xf32, #tpu.memory_space<vmem>>) attributes {dimension_semantics = [#tpu.dimension_semantics<parallel>], iteration_bounds = array<i64: 1>, scalar_prefetch = 0 : i64, scratch_operands = 0 : i64, tpu.core_type = #tpu.core_type<tc>, window_params = [{transform_indices = @transform_0, window_bounds = array<i64: 8, 16>}, {transform_indices = @transform_1, window_bounds = array<i64: 8, 24>}, {pipeline_mode = #tpu.pipeline_mode<synchronous>, transform_indices = @transform_2, window_bounds = array<i64: 16, 8>}, {pipeline_mode = #tpu.pipeline_mode<synchronous>, transform_indices = @transform_3, window_bounds = array<i64: 1, 8>}, {pipeline_mode = #tpu.pipeline_mode<synchronous>, transform_indices = @transform_4, window_bounds = array<i64: 24, 128>}, {pipeline_mode = #tpu.pipeline_mode<synchronous>, transform_indices = @transform_5, window_bounds = array<i64: 8, 128>}, {pipeline_mode = #tpu.pipeline_mode<synchronous>, transform_indices = @transform_6, window_bounds = array<i64: 32, 128>}, {pipeline_mode = #tpu.pipeline_mode<synchronous>, transform_indices = @transform_7, window_bounds = array<i64: 1, 128>}, {pipeline_mode = #tpu.pipeline_mode<synchronous>, transform_indices = @transform_8, window_bounds = array<i64: 1, 128>}, {pipeline_mode = #tpu.pipeline_mode<synchronous>, transform_indices = @transform_9, window_bounds = array<i64: 32, 8>}, {pipeline_mode = #tpu.pipeline_mode<synchronous>, transform_indices = @transform_10, window_bounds = array<i64: 1, 8>}, {transform_indices = @transform_11, window_bounds = array<i64: 8, 64>}]} {
    %c0 = arith.constant 0 : index
    %c0_0 = arith.constant 0 : index
    %0 = vector.load %arg1[%c0, %c0_0] : memref<8x16xf32, #tpu.memory_space<vmem>>, vector<8x16xf32>
    %c0_1 = arith.constant 0 : index
    %c0_2 = arith.constant 0 : index
    %1 = vector.load %arg3[%c0_1, %c0_2] : memref<16x8xf32, #tpu.memory_space<vmem>>, vector<16x8xf32>
    %cst = arith.constant dense<0.000000e+00> : vector<8x8xf32>
    %2 = tpu.matmul %0, %1, %cst {dimension_numbers = #tpu.dot_dimension_numbers<[1], [0], [0], [1], [0, 0, 1, 1], [], []>} : vector<8x16xf32>, vector<16x8xf32>, vector<8x8xf32> -> vector<8x8xf32>
    %c0_3 = arith.constant 0 : index
    %c0_4 = arith.constant 0 : index
    %3 = vector.load %arg4[%c0_3, %c0_4] : memref<1x8xf32, #tpu.memory_space<vmem>>, vector<1x8xf32>
    %4 = vector.broadcast %3 : vector<1x8xf32> to vector<8x8xf32>
    %5 = arith.addf %2, %4 : vector<8x8xf32>
    %c0_5 = arith.constant 0 : index
    %c0_6 = arith.constant 0 : index
    %6 = vector.load %arg2[%c0_5, %c0_6] : memref<8x24xf32, #tpu.memory_space<vmem>>, vector<8x24xf32>
    %c0_7 = arith.constant 0 : index
    %c0_8 = arith.constant 0 : index
    %7 = vector.load %arg5[%c0_7, %c0_8] : memref<24x128xf32, #tpu.memory_space<vmem>>, vector<24x128xf32>
    %cst_9 = arith.constant dense<0.000000e+00> : vector<8x128xf32>
    %8 = tpu.matmul %6, %7, %cst_9 {dimension_numbers = #tpu.dot_dimension_numbers<[1], [0], [0], [1], [0, 0, 1, 1], [], []>} : vector<8x24xf32>, vector<24x128xf32>, vector<8x128xf32> -> vector<8x128xf32>
    %c0_10 = arith.constant 0 : index
    %c0_11 = arith.constant 0 : index
    %9 = vector.load %arg8[%c0_10, %c0_11] : memref<1x128xf32, #tpu.memory_space<vmem>>, vector<1x128xf32>
    %10 = vector.broadcast %9 : vector<1x128xf32> to vector<8x128xf32>
    %11 = arith.addf %8, %10 : vector<8x128xf32>
    %c0_12 = arith.constant 0 : index
    %c0_13 = arith.constant 0 : index
    %12 = vector.load %arg9[%c0_12, %c0_13] : memref<1x128xf32, #tpu.memory_space<vmem>>, vector<1x128xf32>
    %13 = vector.broadcast %12 : vector<1x128xf32> to vector<8x128xf32>
    %14 = arith.addf %8, %13 : vector<8x128xf32>
    %c0_14 = arith.constant 0 : index
    %c0_15 = arith.constant 0 : index
    %15 = vector.load %arg7[%c0_14, %c0_15] : memref<32x128xf32, #tpu.memory_space<vmem>>, vector<32x128xf32>
    %c0_16 = arith.constant 0 : index
    %c0_17 = arith.constant 0 : index
    %16 = vector.load %arg10[%c0_16, %c0_17] : memref<32x8xf32, #tpu.memory_space<vmem>>, vector<32x8xf32>
    %c0_18 = arith.constant 0 : index
    %c0_19 = arith.constant 0 : index
    %17 = vector.load %arg11[%c0_18, %c0_19] : memref<1x8xf32, #tpu.memory_space<vmem>>, vector<1x8xf32>
    %18 = vector.shape_cast %17 : vector<1x8xf32> to vector<1x8xf32>
    %19 = vector.broadcast %18 : vector<1x8xf32> to vector<8x8xf32>
    %c0_20 = arith.constant 0 : index
    %c0_21 = arith.constant 0 : index
    %20 = vector.load %arg6[%c0_20, %c0_21] : memref<8x128xf32, #tpu.memory_space<vmem>>, vector<8x128xf32>
    %cst_22 = arith.constant dense<0.000000e+00> : vector<8x128xf32>
    %21 = tpu.matmul %5, %20, %cst_22 {dimension_numbers = #tpu.dot_dimension_numbers<[1], [0], [0], [1], [0, 0, 1, 1], [], []>} : vector<8x8xf32>, vector<8x128xf32>, vector<8x128xf32> -> vector<8x128xf32>
    %22 = arith.addf %11, %21 : vector<8x128xf32>
    %23 = arith.negf %22 : vector<8x128xf32>
    %24 = math.exp %23 : vector<8x128xf32>
    %cst_23 = arith.constant 1.000000e+00 : f32
    %25 = vector.broadcast %cst_23 : f32 to vector<8x128xf32>
    %26 = arith.addf %25, %24 : vector<8x128xf32>
    %27 = arith.divf %25, %26 : vector<8x128xf32>
    %28 = math.tanh %22 : vector<8x128xf32>
    %29 = vector.extract_strided_slice %27 {offsets = [0, 0], sizes = [8, 32], strides = [1, 1]} : vector<8x128xf32> to vector<8x32xf32>
    %30 = vector.extract_strided_slice %28 {offsets = [0, 64], sizes = [8, 32], strides = [1, 1]} : vector<8x128xf32> to vector<8x32xf32>
    %31 = arith.mulf %29, %30 : vector<8x32xf32>
    %32 = vector.extract_strided_slice %27 {offsets = [0, 96], sizes = [8, 32], strides = [1, 1]} : vector<8x128xf32> to vector<8x32xf32>
    %33 = math.tanh %31 : vector<8x32xf32>
    %34 = arith.mulf %32, %33 : vector<8x32xf32>
    %cst_24 = arith.constant dense<0.000000e+00> : vector<8x8xf32>
    %35 = tpu.matmul %34, %16, %cst_24 {dimension_numbers = #tpu.dot_dimension_numbers<[1], [0], [0], [1], [0, 0, 1, 1], [], []>} : vector<8x32xf32>, vector<32x8xf32>, vector<8x8xf32> -> vector<8x8xf32>
    %36 = arith.addf %35, %19 : vector<8x8xf32>
    %c0_25 = arith.constant 0 : index
    %c0_26 = arith.constant 0 : index
    %37 = vector.load %arg12[%c0_25, %c0_26] : memref<8x64xf32, #tpu.memory_space<vmem>>, vector<8x8xf32>
    tpu.vector_store %arg12[%c0_25, %c0_26], %36 {strides = array<i32>} : memref<8x64xf32, #tpu.memory_space<vmem>>, vector<8x8xf32>,
    %cst_27 = arith.constant dense<0.000000e+00> : vector<8x128xf32>
    %38 = tpu.matmul %34, %15, %cst_27 {dimension_numbers = #tpu.dot_dimension_numbers<[1], [0], [0], [1], [0, 0, 1, 1], [], []>} : vector<8x32xf32>, vector<32x128xf32>, vector<8x128xf32> -> vector<8x128xf32>
    %39 = arith.addf %14, %38 : vector<8x128xf32>
    %40 = arith.negf %39 : vector<8x128xf32>
    %41 = math.exp %40 : vector<8x128xf32>
    %cst_28 = arith.constant 1.000000e+00 : f32
    %42 = vector.broadcast %cst_28 : f32 to vector<8x128xf32>
    %43 = arith.addf %42, %41 : vector<8x128xf32>
    %44 = arith.divf %42, %43 : vector<8x128xf32>
    %45 = math.tanh %39 : vector<8x128xf32>
    %46 = vector.extract_strided_slice %44 {offsets = [0, 32], sizes = [8, 32], strides = [1, 1]} : vector<8x128xf32> to vector<8x32xf32>
    %47 = arith.mulf %46, %31 : vector<8x32xf32>
    %48 = vector.extract_strided_slice %44 {offsets = [0, 0], sizes = [8, 32], strides = [1, 1]} : vector<8x128xf32> to vector<8x32xf32>
    %49 = vector.extract_strided_slice %45 {offsets = [0, 64], sizes = [8, 32], strides = [1, 1]} : vector<8x128xf32> to vector<8x32xf32>
    %50 = arith.mulf %48, %49 : vector<8x32xf32>
    %51 = arith.addf %47, %50 : vector<8x32xf32>
    %52 = vector.extract_strided_slice %44 {offsets = [0, 96], sizes = [8, 32], strides = [1, 1]} : vector<8x128xf32> to vector<8x32xf32>
    %53 = math.tanh %51 : vector<8x32xf32>
    %54 = arith.mulf %52, %53 : vector<8x32xf32>
    %cst_29 = arith.constant dense<0.000000e+00> : vector<8x8xf32>
    %55 = tpu.matmul %54, %16, %cst_29 {dimension_numbers = #tpu.dot_dimension_numbers<[1], [0], [0], [1], [0, 0, 1, 1], [], []>} : vector<8x32xf32>, vector<32x8xf32>, vector<8x8xf32> -> vector<8x8xf32>
    %56 = arith.addf %55, %19 : vector<8x8xf32>
    %c0_30 = arith.constant 0 : index
    %c8 = arith.constant 8 : index
    %57 = vector.load %arg12[%c0_30, %c8] : memref<8x64xf32, #tpu.memory_space<vmem>>, vector<8x8xf32>
    tpu.vector_store %arg12[%c0_30, %c8], %56 {strides = array<i32>} : memref<8x64xf32, #tpu.memory_space<vmem>>, vector<8x8xf32>,
    %cst_31 = arith.constant dense<0.000000e+00> : vector<8x128xf32>
    %58 = tpu.matmul %54, %15, %cst_31 {dimension_numbers = #tpu.dot_dimension_numbers<[1], [0], [0], [1], [0, 0, 1, 1], [], []>} : vector<8x32xf32>, vector<32x128xf32>, vector<8x128xf32> -> vector<8x128xf32>
    %59 = arith.addf %14, %58 : vector<8x128xf32>
    %60 = arith.negf %59 : vector<8x128xf32>
    %61 = math.exp %60 : vector<8x128xf32>
    %cst_32 = arith.constant 1.000000e+00 : f32
    %62 = vector.broadcast %cst_32 : f32 to vector<8x128xf32>
    %63 = arith.addf %62, %61 : vector<8x128xf32>
    %64 = arith.divf %62, %63 : vector<8x128xf32>
    %65 = math.tanh %59 : vector<8x128xf32>
    %66 = vector.extract_strided_slice %64 {offsets = [0, 32], sizes = [8, 32], strides = [1, 1]} : vector<8x128xf32> to vector<8x32xf32>
    %67 = arith.mulf %66, %51 : vector<8x32xf32>
    %68 = vector.extract_strided_slice %64 {offsets = [0, 0], sizes = [8, 32], strides = [1, 1]} : vector<8x128xf32> to vector<8x32xf32>
    %69 = vector.extract_strided_slice %65 {offsets = [0, 64], sizes = [8, 32], strides = [1, 1]} : vector<8x128xf32> to vector<8x32xf32>
    %70 = arith.mulf %68, %69 : vector<8x32xf32>
    %71 = arith.addf %67, %70 : vector<8x32xf32>
    %72 = vector.extract_strided_slice %64 {offsets = [0, 96], sizes = [8, 32], strides = [1, 1]} : vector<8x128xf32> to vector<8x32xf32>
    %73 = math.tanh %71 : vector<8x32xf32>
    %74 = arith.mulf %72, %73 : vector<8x32xf32>
    %cst_33 = arith.constant dense<0.000000e+00> : vector<8x8xf32>
    %75 = tpu.matmul %74, %16, %cst_33 {dimension_numbers = #tpu.dot_dimension_numbers<[1], [0], [0], [1], [0, 0, 1, 1], [], []>} : vector<8x32xf32>, vector<32x8xf32>, vector<8x8xf32> -> vector<8x8xf32>
    %76 = arith.addf %75, %19 : vector<8x8xf32>
    %c0_34 = arith.constant 0 : index
    %c16 = arith.constant 16 : index
    %77 = vector.load %arg12[%c0_34, %c16] : memref<8x64xf32, #tpu.memory_space<vmem>>, vector<8x8xf32>
    tpu.vector_store %arg12[%c0_34, %c16], %76 {strides = array<i32>} : memref<8x64xf32, #tpu.memory_space<vmem>>, vector<8x8xf32>,
    %cst_35 = arith.constant dense<0.000000e+00> : vector<8x128xf32>
    %78 = tpu.matmul %74, %15, %cst_35 {dimension_numbers = #tpu.dot_dimension_numbers<[1], [0], [0], [1], [0, 0, 1, 1], [], []>} : vector<8x32xf32>, vector<32x128xf32>, vector<8x128xf32> -> vector<8x128xf32>
    %79 = arith.addf %14, %78 : vector<8x128xf32>
    %80 = arith.negf %79 : vector<8x128xf32>
    %81 = math.exp %80 : vector<8x128xf32>
    %cst_36 = arith.constant 1.000000e+00 : f32
    %82 = vector.broadcast %cst_36 : f32 to vector<8x128xf32>
    %83 = arith.addf %82, %81 : vector<8x128xf32>
    %84 = arith.divf %82, %83 : vector<8x128xf32>
    %85 = math.tanh %79 : vector<8x128xf32>
    %86 = vector.extract_strided_slice %84 {offsets = [0, 32], sizes = [8, 32], strides = [1, 1]} : vector<8x128xf32> to vector<8x32xf32>
    %87 = arith.mulf %86, %71 : vector<8x32xf32>
    %88 = vector.extract_strided_slice %84 {offsets = [0, 0], sizes = [8, 32], strides = [1, 1]} : vector<8x128xf32> to vector<8x32xf32>
    %89 = vector.extract_strided_slice %85 {offsets = [0, 64], sizes = [8, 32], strides = [1, 1]} : vector<8x128xf32> to vector<8x32xf32>
    %90 = arith.mulf %88, %89 : vector<8x32xf32>
    %91 = arith.addf %87, %90 : vector<8x32xf32>
    %92 = vector.extract_strided_slice %84 {offsets = [0, 96], sizes = [8, 32], strides = [1, 1]} : vector<8x128xf32> to vector<8x32xf32>
    %93 = math.tanh %91 : vector<8x32xf32>
    %94 = arith.mulf %92, %93 : vector<8x32xf32>
    %cst_37 = arith.constant dense<0.000000e+00> : vector<8x8xf32>
    %95 = tpu.matmul %94, %16, %cst_37 {dimension_numbers = #tpu.dot_dimension_numbers<[1], [0], [0], [1], [0, 0, 1, 1], [], []>} : vector<8x32xf32>, vector<32x8xf32>, vector<8x8xf32> -> vector<8x8xf32>
    %96 = arith.addf %95, %19 : vector<8x8xf32>
    %c0_38 = arith.constant 0 : index
    %c24 = arith.constant 24 : index
    %97 = vector.load %arg12[%c0_38, %c24] : memref<8x64xf32, #tpu.memory_space<vmem>>, vector<8x8xf32>
    tpu.vector_store %arg12[%c0_38, %c24], %96 {strides = array<i32>} : memref<8x64xf32, #tpu.memory_space<vmem>>, vector<8x8xf32>,
    %cst_39 = arith.constant dense<0.000000e+00> : vector<8x128xf32>
    %98 = tpu.matmul %94, %15, %cst_39 {dimension_numbers = #tpu.dot_dimension_numbers<[1], [0], [0], [1], [0, 0, 1, 1], [], []>} : vector<8x32xf32>, vector<32x128xf32>, vector<8x128xf32> -> vector<8x128xf32>
    %99 = arith.addf %14, %98 : vector<8x128xf32>
    %100 = arith.negf %99 : vector<8x128xf32>
    %101 = math.exp %100 : vector<8x128xf32>
    %cst_40 = arith.constant 1.000000e+00 : f32
    %102 = vector.broadcast %cst_40 : f32 to vector<8x128xf32>
    %103 = arith.addf %102, %101 : vector<8x128xf32>
    %104 = arith.divf %102, %103 : vector<8x128xf32>
    %105 = math.tanh %99 : vector<8x128xf32>
    %106 = vector.extract_strided_slice %104 {offsets = [0, 32], sizes = [8, 32], strides = [1, 1]} : vector<8x128xf32> to vector<8x32xf32>
    %107 = arith.mulf %106, %91 : vector<8x32xf32>
    %108 = vector.extract_strided_slice %104 {offsets = [0, 0], sizes = [8, 32], strides = [1, 1]} : vector<8x128xf32> to vector<8x32xf32>
    %109 = vector.extract_strided_slice %105 {offsets = [0, 64], sizes = [8, 32], strides = [1, 1]} : vector<8x128xf32> to vector<8x32xf32>
    %110 = arith.mulf %108, %109 : vector<8x32xf32>
    %111 = arith.addf %107, %110 : vector<8x32xf32>
    %112 = vector.extract_strided_slice %104 {offsets = [0, 96], sizes = [8, 32], strides = [1, 1]} : vector<8x128xf32> to vector<8x32xf32>
    %113 = math.tanh %111 : vector<8x32xf32>
    %114 = arith.mulf %112, %113 : vector<8x32xf32>
    %cst_41 = arith.constant dense<0.000000e+00> : vector<8x8xf32>
    %115 = tpu.matmul %114, %16, %cst_41 {dimension_numbers = #tpu.dot_dimension_numbers<[1], [0], [0], [1], [0, 0, 1, 1], [], []>} : vector<8x32xf32>, vector<32x8xf32>, vector<8x8xf32> -> vector<8x8xf32>
    %116 = arith.addf %115, %19 : vector<8x8xf32>
    %c0_42 = arith.constant 0 : index
    %c32 = arith.constant 32 : index
    %117 = vector.load %arg12[%c0_42, %c32] : memref<8x64xf32, #tpu.memory_space<vmem>>, vector<8x8xf32>
    tpu.vector_store %arg12[%c0_42, %c32], %116 {strides = array<i32>} : memref<8x64xf32, #tpu.memory_space<vmem>>, vector<8x8xf32>,
    %cst_43 = arith.constant dense<0.000000e+00> : vector<8x128xf32>
    %118 = tpu.matmul %114, %15, %cst_43 {dimension_numbers = #tpu.dot_dimension_numbers<[1], [0], [0], [1], [0, 0, 1, 1], [], []>} : vector<8x32xf32>, vector<32x128xf32>, vector<8x128xf32> -> vector<8x128xf32>
    %119 = arith.addf %14, %118 : vector<8x128xf32>
    %120 = arith.negf %119 : vector<8x128xf32>
    %121 = math.exp %120 : vector<8x128xf32>
    %cst_44 = arith.constant 1.000000e+00 : f32
    %122 = vector.broadcast %cst_44 : f32 to vector<8x128xf32>
    %123 = arith.addf %122, %121 : vector<8x128xf32>
    %124 = arith.divf %122, %123 : vector<8x128xf32>
    %125 = math.tanh %119 : vector<8x128xf32>
    %126 = vector.extract_strided_slice %124 {offsets = [0, 32], sizes = [8, 32], strides = [1, 1]} : vector<8x128xf32> to vector<8x32xf32>
    %127 = arith.mulf %126, %111 : vector<8x32xf32>
    %128 = vector.extract_strided_slice %124 {offsets = [0, 0], sizes = [8, 32], strides = [1, 1]} : vector<8x128xf32> to vector<8x32xf32>
    %129 = vector.extract_strided_slice %125 {offsets = [0, 64], sizes = [8, 32], strides = [1, 1]} : vector<8x128xf32> to vector<8x32xf32>
    %130 = arith.mulf %128, %129 : vector<8x32xf32>
    %131 = arith.addf %127, %130 : vector<8x32xf32>
    %132 = vector.extract_strided_slice %124 {offsets = [0, 96], sizes = [8, 32], strides = [1, 1]} : vector<8x128xf32> to vector<8x32xf32>
    %133 = math.tanh %131 : vector<8x32xf32>
    %134 = arith.mulf %132, %133 : vector<8x32xf32>
    %cst_45 = arith.constant dense<0.000000e+00> : vector<8x8xf32>
    %135 = tpu.matmul %134, %16, %cst_45 {dimension_numbers = #tpu.dot_dimension_numbers<[1], [0], [0], [1], [0, 0, 1, 1], [], []>} : vector<8x32xf32>, vector<32x8xf32>, vector<8x8xf32> -> vector<8x8xf32>
    %136 = arith.addf %135, %19 : vector<8x8xf32>
    %c0_46 = arith.constant 0 : index
    %c40 = arith.constant 40 : index
    %137 = vector.load %arg12[%c0_46, %c40] : memref<8x64xf32, #tpu.memory_space<vmem>>, vector<8x8xf32>
    tpu.vector_store %arg12[%c0_46, %c40], %136 {strides = array<i32>} : memref<8x64xf32, #tpu.memory_space<vmem>>, vector<8x8xf32>,
    %cst_47 = arith.constant dense<0.000000e+00> : vector<8x128xf32>
    %138 = tpu.matmul %134, %15, %cst_47 {dimension_numbers = #tpu.dot_dimension_numbers<[1], [0], [0], [1], [0, 0, 1, 1], [], []>} : vector<8x32xf32>, vector<32x128xf32>, vector<8x128xf32> -> vector<8x128xf32>
    %139 = arith.addf %14, %138 : vector<8x128xf32>
    %140 = arith.negf %139 : vector<8x128xf32>
    %141 = math.exp %140 : vector<8x128xf32>
    %cst_48 = arith.constant 1.000000e+00 : f32
    %142 = vector.broadcast %cst_48 : f32 to vector<8x128xf32>
    %143 = arith.addf %142, %141 : vector<8x128xf32>
    %144 = arith.divf %142, %143 : vector<8x128xf32>
    %145 = math.tanh %139 : vector<8x128xf32>
    %146 = vector.extract_strided_slice %144 {offsets = [0, 32], sizes = [8, 32], strides = [1, 1]} : vector<8x128xf32> to vector<8x32xf32>
    %147 = arith.mulf %146, %131 : vector<8x32xf32>
    %148 = vector.extract_strided_slice %144 {offsets = [0, 0], sizes = [8, 32], strides = [1, 1]} : vector<8x128xf32> to vector<8x32xf32>
    %149 = vector.extract_strided_slice %145 {offsets = [0, 64], sizes = [8, 32], strides = [1, 1]} : vector<8x128xf32> to vector<8x32xf32>
    %150 = arith.mulf %148, %149 : vector<8x32xf32>
    %151 = arith.addf %147, %150 : vector<8x32xf32>
    %152 = vector.extract_strided_slice %144 {offsets = [0, 96], sizes = [8, 32], strides = [1, 1]} : vector<8x128xf32> to vector<8x32xf32>
    %153 = math.tanh %151 : vector<8x32xf32>
    %154 = arith.mulf %152, %153 : vector<8x32xf32>
    %cst_49 = arith.constant dense<0.000000e+00> : vector<8x8xf32>
    %155 = tpu.matmul %154, %16, %cst_49 {dimension_numbers = #tpu.dot_dimension_numbers<[1], [0], [0], [1], [0, 0, 1, 1], [], []>} : vector<8x32xf32>, vector<32x8xf32>, vector<8x8xf32> -> vector<8x8xf32>
    %156 = arith.addf %155, %19 : vector<8x8xf32>
    %c0_50 = arith.constant 0 : index
    %c48 = arith.constant 48 : index
    %157 = vector.load %arg12[%c0_50, %c48] : memref<8x64xf32, #tpu.memory_space<vmem>>, vector<8x8xf32>
    tpu.vector_store %arg12[%c0_50, %c48], %156 {strides = array<i32>} : memref<8x64xf32, #tpu.memory_space<vmem>>, vector<8x8xf32>,
    %cst_51 = arith.constant dense<0.000000e+00> : vector<8x128xf32>
    %158 = tpu.matmul %154, %15, %cst_51 {dimension_numbers = #tpu.dot_dimension_numbers<[1], [0], [0], [1], [0, 0, 1, 1], [], []>} : vector<8x32xf32>, vector<32x128xf32>, vector<8x128xf32> -> vector<8x128xf32>
    %159 = arith.addf %14, %158 : vector<8x128xf32>
    %160 = arith.negf %159 : vector<8x128xf32>
    %161 = math.exp %160 : vector<8x128xf32>
    %cst_52 = arith.constant 1.000000e+00 : f32
    %162 = vector.broadcast %cst_52 : f32 to vector<8x128xf32>
    %163 = arith.addf %162, %161 : vector<8x128xf32>
    %164 = arith.divf %162, %163 : vector<8x128xf32>
    %165 = math.tanh %159 : vector<8x128xf32>
    %166 = vector.extract_strided_slice %164 {offsets = [0, 32], sizes = [8, 32], strides = [1, 1]} : vector<8x128xf32> to vector<8x32xf32>
    %167 = arith.mulf %166, %151 : vector<8x32xf32>
    %168 = vector.extract_strided_slice %164 {offsets = [0, 0], sizes = [8, 32], strides = [1, 1]} : vector<8x128xf32> to vector<8x32xf32>
    %169 = vector.extract_strided_slice %165 {offsets = [0, 64], sizes = [8, 32], strides = [1, 1]} : vector<8x128xf32> to vector<8x32xf32>
    %170 = arith.mulf %168, %169 : vector<8x32xf32>
    %171 = arith.addf %167, %170 : vector<8x32xf32>
    %172 = vector.extract_strided_slice %164 {offsets = [0, 96], sizes = [8, 32], strides = [1, 1]} : vector<8x128xf32> to vector<8x32xf32>
    %173 = math.tanh %171 : vector<8x32xf32>
    %174 = arith.mulf %172, %173 : vector<8x32xf32>
    %cst_53 = arith.constant dense<0.000000e+00> : vector<8x8xf32>
    %175 = tpu.matmul %174, %16, %cst_53 {dimension_numbers = #tpu.dot_dimension_numbers<[1], [0], [0], [1], [0, 0, 1, 1], [], []>} : vector<8x32xf32>, vector<32x8xf32>, vector<8x8xf32> -> vector<8x8xf32>
    %176 = arith.addf %175, %19 : vector<8x8xf32>
    %c0_54 = arith.constant 0 : index
    %c56 = arith.constant 56 : index
    %177 = vector.load %arg12[%c0_54, %c56] : memref<8x64xf32, #tpu.memory_space<vmem>>, vector<8x8xf32>
    tpu.vector_store %arg12[%c0_54, %c56], %176 {strides = array<i32>} : memref<8x64xf32, #tpu.memory_space<vmem>>, vector<8x8xf32>,
    return
  }
  func.func @transform_0(%arg0: i32) -> (i32, i32) {
    %c0_i32 = arith.constant 0 : i32
    %c0_i32_0 = arith.constant 0 : i32
    return %arg0, %c0_i32 : i32, i32
  }
  func.func @transform_1(%arg0: i32) -> (i32, i32) {
    %c0_i32 = arith.constant 0 : i32
    %c0_i32_0 = arith.constant 0 : i32
    return %arg0, %c0_i32 : i32, i32
  }
  func.func @transform_2(%arg0: i32) -> (i32, i32) {
    %c0_i32 = arith.constant 0 : i32
    %c0_i32_0 = arith.constant 0 : i32
    %c0_i32_1 = arith.constant 0 : i32
    return %c0_i32, %c0_i32_0 : i32, i32
  }
  func.func @transform_3(%arg0: i32) -> (i32, i32) {
    %c0_i32 = arith.constant 0 : i32
    %c0_i32_0 = arith.constant 0 : i32
    %c0_i32_1 = arith.constant 0 : i32
    return %c0_i32, %c0_i32_0 : i32, i32
  }
  func.func @transform_4(%arg0: i32) -> (i32, i32) {
    %c0_i32 = arith.constant 0 : i32
    %c0_i32_0 = arith.constant 0 : i32
    %c0_i32_1 = arith.constant 0 : i32
    return %c0_i32, %c0_i32_0 : i32, i32
  }
  func.func @transform_5(%arg0: i32) -> (i32, i32) {
    %c0_i32 = arith.constant 0 : i32
    %c0_i32_0 = arith.constant 0 : i32
    %c0_i32_1 = arith.constant 0 : i32
    return %c0_i32, %c0_i32_0 : i32, i32
  }
  func.func @transform_6(%arg0: i32) -> (i32, i32) {
    %c0_i32 = arith.constant 0 : i32
    %c0_i32_0 = arith.constant 0 : i32
    %c0_i32_1 = arith.constant 0 : i32
    return %c0_i32, %c0_i32_0 : i32, i32
  }
  func.func @transform_7(%arg0: i32) -> (i32, i32) {
    %c0_i32 = arith.constant 0 : i32
    %c0_i32_0 = arith.constant 0 : i32
    %c0_i32_1 = arith.constant 0 : i32
    return %c0_i32, %c0_i32_0 : i32, i32
  }
  func.func @transform_8(%arg0: i32) -> (i32, i32) {
    %c0_i32 = arith.constant 0 : i32
    %c0_i32_0 = arith.constant 0 : i32
    %c0_i32_1 = arith.constant 0 : i32
    return %c0_i32, %c0_i32_0 : i32, i32
  }
  func.func @transform_9(%arg0: i32) -> (i32, i32) {
    %c0_i32 = arith.constant 0 : i32
    %c0_i32_0 = arith.constant 0 : i32
    %c0_i32_1 = arith.constant 0 : i32
    return %c0_i32, %c0_i32_0 : i32, i32
  }
  func.func @transform_10(%arg0: i32) -> (i32, i32) {
    %c0_i32 = arith.constant 0 : i32
    %c0_i32_0 = arith.constant 0 : i32
    %c0_i32_1 = arith.constant 0 : i32
    return %c0_i32, %c0_i32_0 : i32, i32
  }
  func.func @transform_11(%arg0: i32) -> (i32, i32) {
    %c0_i32 = arith.constant 0 : i32
    %c0_i32_0 = arith.constant 0 : i32
    return %arg0, %c0_i32 : i32, i32
  }
}

</mosaic_0001>

<bundles_post_ra>
// kernel: tpu_custom_call.1
= control target key start
LH: loop header
LB: loop body
LE: loop exit
PB: predicated region body
PF: predicated region fallthrough
CT: control target
= control target key end

     0   :  { %16 = vsyncpa [#allocation3], 0  ;;  %s1383_s0 = inlined_call_operand.hbm [shape: f32[8,16], index: 0, kind: input, shape index: {}]   ;;  %s1384_s1 = inlined_call_operand.hbm [shape: f32[8,24], index: 1, kind: input, shape index: {}]   ;;  %s1385_s2 = inlined_call_operand.vmem [shape: f32[16,8], index: 2, kind: input, shape index: {}]   ;;  %s1386_s3 = inlined_call_operand.vmem [shape: f32[1,8], index: 3, kind: input, shape index: {}]   ;;  %s1387_s4 = inlined_call_operand.vmem [shape: f32[24,128], index: 4, kind: input, shape index: {}]   ;;  %s1388_s5 = inlined_call_operand.hbm [shape: f32[8,128], index: 5, kind: input, shape index: {}]   ;;  %s1389_s6 = inlined_call_operand.vmem [shape: f32[32,128], index: 6, kind: input, shape index: {}]   ;;  %s1390_s7 = inlined_call_operand.vmem [shape: f32[1,128], index: 7, kind: input, shape index: {}]   ;;  %s1391_s8 = inlined_call_operand.vmem [shape: f32[1,128], index: 8, kind: input, shape index: {}]   ;;  %s1392_s9 = inlined_call_operand.vmem [shape: f32[32,8], index: 9, kind: input, shape index: {}]   ;;  %s1393_s10 = inlined_call_operand.vmem [shape: f32[1,8], index: 10, kind: input, shape index: {}]   ;;  %s1394_s11 = inlined_call_operand.hbm [shape: f32[8,64], index: 11, kind: output, shape index: {}]  }
   0x1   :  { %17 = vsyncpa [#allocation6], 0  ;;  %s35_s19 = sshll.u32 %s1384_s1, 4  ;;  %s36_s19 = int_to_ptr.hbm [resolvable:$true] %s35_s19 }
   0x2   :  { %18 = vsyncpa [#allocation4], 0  ;;  %s1099_s20 = smov [#allocation5]   ;;  %s24_s24 = sshll.u32 %s1383_s0, 4  ;;  %s25_s24 = int_to_ptr.hbm [resolvable:$true] %s24_s24 }
   0x3   :  { %s37_s21 = sshll.u32 %s1099_s20, 4  ;;  %s1100_s25 = smov [#allocation2]   ;;  %s38_s21 = int_to_ptr.vmem [resolvable:$true] %s37_s21 }
   0x4   :  { %40 = dma.hbm_to_vmem [thread:$0]  %s36_s19, 128, %s38_s21, [#allocation6]  }
   0x5   :  { %s26_s26 = sshll.u32 %s1100_s25, 4  ;;  %s52_s29 = sshll.u32 %s1388_s5, 4  ;;  %s27_s26 = int_to_ptr.vmem [resolvable:$true] %s26_s26  ;;  %s53_s29 = int_to_ptr.hbm [resolvable:$true] %s52_s29 }
   0x6   :  { %29 = dma.hbm_to_vmem [thread:$0]  %s25_s24, 128, %s27_s26, [#allocation3]  }
   0x7   :  { %s1101_s1 = smov [#allocation7]  }
   0x8   :  { %s54_s30 = sshll.u32 %s1101_s1, 4  ;;  %s55_s30 = int_to_ptr.vmem [resolvable:$true] %s54_s30 }
   0x9   :  { %57 = dma.hbm_to_vmem [thread:$0]  %s53_s29, 128, %s55_s30, [#allocation6]  }
   0xa   :  { %1093 = dma.done.wait [#allocation3], 128  }
   0xb   :  { %1094 = vsyncadd [#allocation3], 4294967168 }
   0xc   :  { %1095 = dma.done.wait [#allocation6], 256  }
   0xd   :  { %1096 = vsyncadd [#allocation6], 4294967040  ;;  %v82_v0 = vld [vmem:[%s1385_s2 + $0x8] sm:$0xff]  ;;  %v81_v1 = vld [vmem:[%s1385_s2] sm:$0xff]  ;;  %vm87_vm0 = vcmask 130048   ;;  %vm115_vm1 = vcmask 195584  }
   0xe   :  { %105 = vmatpush.msra.mxu0 %v82_v0  ;;  %v80_v2 = vld [vmem:[#allocation2] sm:$0xff]  ;;  %v114_v3 = vld [vmem:[%s1387_s4 + $0x10] sm:$0xff]  ;;  %v113_v5 = vld [vmem:[%s1387_s4 + $0x8] sm:$0xff]  ;;  %vm162_vm2 = vcmask 64512   ;;  %vm221_vm7 = vcmask 261120   ;;  %s1107_s19 = smov 40  }
   0xf   :  { %v161_v4 = vld [vmem:[#allocation7] sm:$0xff]  ;;  %132 = vmatpush.msra.mxu1 %v114_v3  ;;  %v112_v6 = vld [vmem:[%s1387_s4] sm:$0xff]  ;;  %v111_v7 = vld [vmem:[#allocation5] sm:$0xff]  ;;  %s1102_s4 = smov 64   ;;  %s1108_s2 = smov 24  }
  0x10   :  { %106 = vmatpush.msra.mxu0 %v81_v1  ;;  %181 = vmatpush.msra.mxu2 %v161_v4  ;;  %v929_v8 = vld [vmem:[%s1386_s3] ss:$0 sm:$0xff]  ;;  %s1103_s3 = smov 32   ;;  %v1211_v33 = vld [vmem:[%s1389_s6 + $0x18] sm:$0xff]  ;;  %v1221_v35 = vld [vmem:[%s1389_s6 + $0x10] sm:$0xff]  ;;  %s1109_s20 = smov 48  }
  0x11   :  { %890 = vmatmul.msk.f32.vlgmr.msra.gmra.mxu0 %vm87_vm0, %v80_v2  ;;  %133 = vmatpush.msra.mxu1 %v113_v5  ;;  %v930_v11 = vld [vmem:[%s1390_s7] ss:$0 sm:$0xff]  ;;  %s1104_s7 = smov 96   ;;  %v1216_v34 = vld [vmem:[%s1392_s9 + $0x18] sm:$0xff]  ;;  %v1228_v36 = vld [vmem:[%s1392_s9 + $0x10] sm:$0xff]  ;;  %s1110_s21 = smov 56  }
  0x12   :  { %257 = vmatpush.msrb.mxu2 %v1211_v33  ;;  %236 = vmatpush.msra.mxu3 %v1216_v34  ;;  %v1233_v37 = vld [vmem:[%s1389_s6 + $0x8] sm:$0xff]  ;;  %v1247_v39 = vld [vmem:[%s1389_s6] sm:$0xff]  ;;  %s1111_s22 = smov [#allocation8]   ;;  %s879_s23 = sshll.u32 %s1394_s11, 4  ;;  %s880_s23 = int_to_ptr.hbm [resolvable:$true] %s879_s23 }
  0x13   :  { %134 = vmatpush.msra.mxu1 %v112_v6  ;;  %v1238_v38 = vld [vmem:[%s1392_s9 + $0x8] sm:$0xff]  ;;  %324 = vmatpush.msrb.mxu0 %v1216_v34  ;;  %v1252_v40 = vld [vmem:[%s1392_s9] sm:$0xff] }
  0x14   :  { %891 = vmatmul.msk.f32.vlgmr.msra.gmra.mxu1 %vm115_vm1, %v111_v7  ;;  %258 = vmatpush.msrb.mxu2 %v1221_v35  ;;  %v931_v44 = vld [vmem:[%s1391_s8] ss:$0 sm:$0xff]  ;;  %s1105_s8 = smov 8  }
  0x15   :  { %350 = vmatpush.msrb.mxu1 %v1211_v33  ;;  %237 = vmatpush.msra.mxu3 %v1228_v36  ;;  %v1297_v45 = vld [vmem:[%s1393_s10] ss:$0 sm:$0xff]  ;;  %s1106_s10 = smov 16  }
  0x16   :  { %325 = vmatpush.msrb.mxu0 %v1228_v36  ;;  %259 = vmatpush.msrb.mxu2 %v1233_v37 }
  0x17   :  { %351 = vmatpush.msrb.mxu1 %v1221_v35  ;;  %238 = vmatpush.msra.mxu3 %v1238_v38 }
  0x18   :  { %326 = vmatpush.msrb.mxu0 %v1238_v38  ;;  %260 = vmatpush.msrb.mxu2 %v1247_v39 }
  0x19   :  { %352 = vmatpush.msrb.mxu1 %v1233_v37  ;;  %239 = vmatpush.msra.mxu3 %v1252_v40 }
  0x1a   :  { %327 = vmatpush.msrb.mxu0 %v1252_v40 }
  0x1b   :  { %353 = vmatpush.msrb.mxu1 %v1247_v39  ;;  %413 = vmatpush.msrb.mxu3 %v1216_v34 }
  0x1c   :  { %502 = vmatpush.msra.mxu0 %v1216_v34 }
  0x1d   :  { %528 = vmatpush.msra.mxu1 %v1211_v33  ;;  %414 = vmatpush.msrb.mxu3 %v1228_v36 }
  0x1e   :  { %503 = vmatpush.msra.mxu0 %v1228_v36 }
  0x1f   :  { %529 = vmatpush.msra.mxu1 %v1221_v35  ;;  %415 = vmatpush.msrb.mxu3 %v1238_v38 }
  0x20   :  { %504 = vmatpush.msra.mxu0 %v1238_v38 }
  0x21   :  { %530 = vmatpush.msra.mxu1 %v1233_v37  ;;  %416 = vmatpush.msrb.mxu3 %v1252_v40 }
  0x22   :  { %505 = vmatpush.msra.mxu0 %v1252_v40 }
  0x23   :  { %531 = vmatpush.msra.mxu1 %v1247_v39 }
  0x8e   :  { %v108_v9 = vpop.f32.mrf.mxu0 }
  0x8f   :  { %v109_v10 = vadd.f32 %v929_v8, %v108_v9 }
  0x91   :  { %892 = vmatmul.msk.f32.vlgmr.msra.gmra.mxu2 %vm162_vm2, %v109_v10  ;;  %v1203_v12 = vpop.f32.mrf.mxu1 }
  0x92   :  { %v143_v13 = vadd.f32 %v930_v11, %v1203_v12  ;;  %439 = vmatpush.msra.mxu2 %v1211_v33  ;;  %v1300_v46 = vadd.f32 %v931_v44, %v1203_v12 }
  0x94   :  { %440 = vmatpush.msra.mxu2 %v1221_v35 }
  0x96   :  { %441 = vmatpush.msra.mxu2 %v1233_v37 }
  0x98   :  { %442 = vmatpush.msra.mxu2 %v1247_v39 }
 0x114   :  { %v183_v14 = vpop.f32.mrf.mxu2 }
 0x115   :  { %v186_v15 = vadd.f32 %v183_v14, %v143_v13 }
 0x117   :  { %933 = vtanh.f32 %v186_v15  ;;  %v893_v17 = vmul.f32 -1.442695, %v186_v15 }
 0x119   :  { %935 = vpow2.f32 %v893_v17 }
 0x11d   :  { %v934_v16 = vpop.eup %933 }
 0x11e   :  { %208 = vrot.lane.b32.xlu0 %v934_v16, %s1102_s4 }
 0x11f   :  { %v936_v18 = vpop.eup %935 }
 0x120   :  { %v190_v19 = vadd.f32 1.0, %v936_v18 }
 0x122   :  { %937 = vrcp.f32 %v190_v19  ;;  %v202_v25 = vand.u32 2147483648, %v190_v19  ;;  %vm196_vm4 = vweird.f32 %v190_v19  ;;  %v200_v26 = vand.u32 2147483647, %v190_v19 }
 0x124   :  { %v203_v28 = vor.u32 1.1754944e-38, %v202_v25  ;;  %vm201_vm6 = vcmp.eq.f32.partialorder %v200_v26, 8.507059e+37 }
 0x128   :  { %v938_v20 = vpop.eup %937 }
 0x129   :  { %v192_v21 = vmul.f32 %v938_v20, %v190_v19  ;;  %vm197_vm3 = vweird.f32 %v938_v20 }
 0x12a   :  { %vm198_vm5 = vmor %vm196_vm4, %vm197_vm3 }
 0x12b   :  { %v193_v22 = vsub.f32 1.0, %v192_v21 }
 0x12d   :  { %v194_v23 = vmul.f32 %v938_v20, %v193_v22 }
 0x12f   :  { %v195_v24 = vadd.f32 %v938_v20, %v194_v23 }
 0x131   :  { %v199_v27 = vsel %vm198_vm5, %v938_v20, %v195_v24 }
 0x132   :  { %v204_v30 = vsel %vm201_vm6, %v203_v28, %v199_v27 }
 0x190   :  { %v209_v29 = vpop.permute.xlu0 %208 }
 0x191   :  { %v211_v31 = vmul.f32 %v209_v29, %v204_v30 }
 0x193   :  { %939 = vtanh.f32 %v211_v31  ;;  %287 = vrot.lane.b32.xlu2 %v211_v31, %s1103_s3 }
 0x199   :  { %v940_v32 = vpop.eup %939 }
 0x19a   :  { %214 = vrot.lane.b32.xlu0 %v940_v32, %s1104_s7 }
 0x1ed   :  { %v288_v3 = vpop.permute.xlu2 %287 }
 0x20c   :  { %v215_v41 = vpop.permute.xlu0 %214 }
 0x20d   :  { %v217_v42 = vmul.f32 %v215_v41, %v204_v30 }
 0x20f   :  { %219 = vrot.lane.b32.xlu1 %v217_v42, %s1103_s3 }
 0x281   :  { %v220_v43 = vpop.permute.xlu1 %219 }
 0x282   :  { %894 = vmatmul.msk.f32.vlgmr.msra.gmra.mxu3 %vm221_vm7, %v220_v43  ;;  %895 = vmatmul.msk.f32.vlgmr.msrb.gmra.mxu2 %vm221_vm7, %v220_v43 }
 0x283   :  { %617 = vmatpush.msrb.mxu2 %v1211_v33  ;;  %591 = vmatpush.msra.mxu3 %v1216_v34 }
 0x285   :  { %618 = vmatpush.msrb.mxu2 %v1221_v35  ;;  %592 = vmatpush.msra.mxu3 %v1228_v36 }
 0x287   :  { %619 = vmatpush.msrb.mxu2 %v1233_v37  ;;  %593 = vmatpush.msra.mxu3 %v1238_v38 }
 0x289   :  { %620 = vmatpush.msrb.mxu2 %v1247_v39  ;;  %594 = vmatpush.msra.mxu3 %v1252_v40 }
 0x305   :  { %v241_v47 = vpop.f32.mrf.mxu3  ;;  %v262_v48 = vpop.f32.mrf.mxu2 }
 0x306   :  { %v242_v49 = vadd.f32 %v1297_v45, %v241_v47  ;;  %v265_v50 = vadd.f32 %v262_v48, %v1300_v46 }
 0x308   :  { %244 = vst.msk [vmem:[#allocation8] sm:$0xff] %vm162_vm2, %v242_v49  ;;  %941 = vtanh.f32 %v265_v50  ;;  %v896_v52 = vmul.f32 -1.442695, %v265_v50 }
 0x30a   :  { %943 = vpow2.f32 %v896_v52 }
 0x30e   :  { %v942_v51 = vpop.eup %941 }
 0x30f   :  { %292 = vrot.lane.b32.xlu1 %v942_v51, %s1102_s4 }
 0x310   :  { %v944_v53 = vpop.eup %943 }
 0x311   :  { %v269_v54 = vadd.f32 1.0, %v944_v53 }
 0x313   :  { %945 = vrcp.f32 %v269_v54  ;;  %v281_v60 = vand.u32 2147483648, %v269_v54  ;;  %vm275_vm9 = vweird.f32 %v269_v54  ;;  %v279_v61 = vand.u32 2147483647, %v269_v54 }
 0x315   :  { %v282_v63 = vor.u32 1.1754944e-38, %v281_v60  ;;  %vm280_vm11 = vcmp.eq.f32.partialorder %v279_v61, 8.507059e+37 }
 0x319   :  { %v946_v55 = vpop.eup %945 }
 0x31a   :  { %v271_v56 = vmul.f32 %v946_v55, %v269_v54  ;;  %vm276_vm8 = vweird.f32 %v946_v55 }
 0x31b   :  { %vm277_vm10 = vmor %vm275_vm9, %vm276_vm8 }
 0x31c   :  { %v272_v57 = vsub.f32 1.0, %v271_v56 }
 0x31e   :  { %v273_v58 = vmul.f32 %v946_v55, %v272_v57 }
 0x320   :  { %v274_v59 = vadd.f32 %v946_v55, %v273_v58 }
 0x322   :  { %v278_v62 = vsel %vm277_vm10, %v946_v55, %v274_v59 }
 0x323   :  { %v283_v1 = vsel %vm280_vm11, %v282_v63, %v278_v62 }
 0x324   :  { %v290_v4 = vmul.f32 %v288_v3, %v283_v1 }
 0x381   :  { %v293_v0 = vpop.permute.xlu1 %292 }
 0x382   :  { %v295_v2 = vmul.f32 %v293_v0, %v283_v1 }
 0x384   :  { %297 = vrot.lane.b32.xlu2 %v295_v2, %s1103_s3 }
 0x3de   :  { %v298_v5 = vpop.permute.xlu2 %297 }
 0x3df   :  { %v300_v6 = vadd.f32 %v298_v5, %v290_v4 }
 0x3e1   :  { %947 = vtanh.f32 %v300_v6 }
 0x3e7   :  { %v948_v7 = vpop.eup %947 }
 0x3e8   :  { %303 = vrot.lane.b32.xlu0 %v948_v7, %s1102_s4 }
 0x45a   :  { %v304_v8 = vpop.permute.xlu0 %303 }
 0x45b   :  { %v306_v9 = vmul.f32 %v304_v8, %v283_v1 }
 0x45d   :  { %308 = vrot.lane.b32.xlu1 %v306_v9, %s1103_s3 }
 0x4cf   :  { %v309_v10 = vpop.permute.xlu1 %308 }
 0x4d0   :  { %897 = vmatmul.msk.f32.vlgmr.msrb.gmra.mxu0 %vm221_vm7, %v309_v10  ;;  %898 = vmatmul.msk.f32.vlgmr.msrb.gmra.mxu1 %vm221_vm7, %v309_v10 }
 0x4d1   :  { %706 = vmatpush.msrb.mxu1 %v1211_v33  ;;  %680 = vmatpush.msrb.mxu0 %v1216_v34 }
 0x4d3   :  { %707 = vmatpush.msrb.mxu1 %v1221_v35  ;;  %681 = vmatpush.msrb.mxu0 %v1228_v36 }
 0x4d5   :  { %708 = vmatpush.msrb.mxu1 %v1233_v37  ;;  %682 = vmatpush.msrb.mxu0 %v1238_v38 }
 0x4d7   :  { %709 = vmatpush.msrb.mxu1 %v1247_v39  ;;  %683 = vmatpush.msrb.mxu0 %v1252_v40 }
 0x54d   :  { %v355_v11 = vpop.f32.mrf.mxu1 }
 0x54e   :  { %v358_v12 = vadd.f32 %v355_v11, %v1300_v46 }
 0x550   :  { %949 = vtanh.f32 %v358_v12  ;;  %v899_v14 = vmul.f32 -1.442695, %v358_v12 }
 0x552   :  { %951 = vpow2.f32 %v899_v14 }
 0x556   :  { %v950_v13 = vpop.eup %949 }
 0x557   :  { %381 = vrot.lane.b32.xlu2 %v950_v13, %s1102_s4 }
 0x558   :  { %v952_v15 = vpop.eup %951 }
 0x559   :  { %v362_v16 = vadd.f32 1.0, %v952_v15 }
 0x55b   :  { %953 = vrcp.f32 %v362_v16  ;;  %v374_v22 = vand.u32 2147483648, %v362_v16  ;;  %vm368_vm13 = vweird.f32 %v362_v16  ;;  %v372_v23 = vand.u32 2147483647, %v362_v16 }
 0x55d   :  { %v375_v25 = vor.u32 1.1754944e-38, %v374_v22  ;;  %vm373_vm15 = vcmp.eq.f32.partialorder %v372_v23, 8.507059e+37 }
 0x561   :  { %v954_v17 = vpop.eup %953 }
 0x562   :  { %v364_v18 = vmul.f32 %v954_v17, %v362_v16  ;;  %vm369_vm12 = vweird.f32 %v954_v17 }
 0x563   :  { %vm370_vm14 = vmor %vm368_vm13, %vm369_vm12 }
 0x564   :  { %v365_v19 = vsub.f32 1.0, %v364_v18 }
 0x566   :  { %v366_v20 = vmul.f32 %v954_v17, %v365_v19 }
 0x568   :  { %v367_v21 = vadd.f32 %v954_v17, %v366_v20 }
 0x56a   :  { %v371_v24 = vsel %vm370_vm14, %v954_v17, %v367_v21 }
 0x56b   :  { %v376_v27 = vsel %vm373_vm15, %v375_v25, %v371_v24 }
 0x56c   :  { %v379_v29 = vmul.f32 %v376_v27, %v300_v6 }
 0x5b1   :  { %v382_v26 = vpop.permute.xlu2 %381 }
 0x5b2   :  { %v384_v28 = vmul.f32 %v382_v26, %v376_v27 }
 0x5b4   :  { %386 = vrot.lane.b32.xlu0 %v384_v28, %s1103_s3 }
 0x626   :  { %v387_v30 = vpop.permute.xlu0 %386 }
 0x627   :  { %v389_v31 = vadd.f32 %v387_v30, %v379_v29 }
 0x629   :  { %955 = vtanh.f32 %v389_v31 }
 0x62f   :  { %v956_v32 = vpop.eup %955 }
 0x630   :  { %392 = vrot.lane.b32.xlu1 %v956_v32, %s1102_s4 }
 0x6a2   :  { %v393_v41 = vpop.permute.xlu1 %392 }
 0x6a3   :  { %v395_v42 = vmul.f32 %v393_v41, %v376_v27 }
 0x6a5   :  { %397 = vrot.lane.b32.xlu2 %v395_v42, %s1103_s3 }
 0x6ff   :  { %v398_v43 = vpop.permute.xlu2 %397 }
 0x700   :  { %900 = vmatmul.msk.f32.vlgmr.msrb.gmra.mxu3 %vm221_vm7, %v398_v43  ;;  %901 = vmatmul.msk.f32.vlgmr.msra.gmra.mxu2 %vm221_vm7, %v398_v43 }
 0x701   :  { %795 = vmatpush.msra.mxu2 %v1211_v33  ;;  %769 = vmatpush.msrb.mxu3 %v1216_v34 }
 0x703   :  { %796 = vmatpush.msra.mxu2 %v1221_v35  ;;  %770 = vmatpush.msrb.mxu3 %v1228_v36 }
 0x705   :  { %797 = vmatpush.msra.mxu2 %v1233_v37  ;;  %771 = vmatpush.msrb.mxu3 %v1238_v38 }
 0x707   :  { %798 = vmatpush.msra.mxu2 %v1247_v39  ;;  %772 = vmatpush.msrb.mxu3 %v1252_v40 }
 0x783   :  { %v444_v44 = vpop.f32.mrf.mxu2 }
 0x784   :  { %v447_v47 = vadd.f32 %v444_v44, %v1300_v46 }
 0x786   :  { %957 = vtanh.f32 %v447_v47  ;;  %v902_v33 = vmul.f32 -1.442695, %v447_v47 }
 0x788   :  { %959 = vpow2.f32 %v902_v33 }
 0x78c   :  { %v958_v48 = vpop.eup %957 }
 0x78d   :  { %470 = vrot.lane.b32.xlu0 %v958_v48, %s1102_s4 }
 0x78e   :  { %v960_v35 = vpop.eup %959 }
 0x78f   :  { %v451_v49 = vadd.f32 1.0, %v960_v35 }
 0x791   :  { %961 = vrcp.f32 %v451_v49  ;;  %v463_v39 = vand.u32 2147483648, %v451_v49  ;;  %vm457_vm1 = vweird.f32 %v451_v49  ;;  %v461_v54 = vand.u32 2147483647, %v451_v49 }
 0x793   :  { %v464_v56 = vor.u32 1.1754944e-38, %v463_v39  ;;  %vm462_vm3 = vcmp.eq.f32.partialorder %v461_v54, 8.507059e+37 }
 0x797   :  { %v962_v50 = vpop.eup %961 }
 0x798   :  { %v453_v37 = vmul.f32 %v962_v50, %v451_v49  ;;  %vm458_vm0 = vweird.f32 %v962_v50 }
 0x799   :  { %vm459_vm2 = vmor %vm457_vm1, %vm458_vm0 }
 0x79a   :  { %v454_v51 = vsub.f32 1.0, %v453_v37 }
 0x79c   :  { %v455_v52 = vmul.f32 %v962_v50, %v454_v51 }
 0x79e   :  { %v456_v53 = vadd.f32 %v962_v50, %v455_v52 }
 0x7a0   :  { %v460_v55 = vsel %vm459_vm2, %v962_v50, %v456_v53 }
 0x7a1   :  { %v465_v58 = vsel %vm462_vm3, %v464_v56, %v460_v55 }
 0x7a2   :  { %v468_v60 = vmul.f32 %v465_v58, %v389_v31 }
 0x7ff   :  { %v471_v57 = vpop.permute.xlu0 %470 }
 0x800   :  { %v473_v59 = vmul.f32 %v471_v57, %v465_v58 }
 0x802   :  { %475 = vrot.lane.b32.xlu1 %v473_v59, %s1103_s3 }
 0x874   :  { %v476_v61 = vpop.permute.xlu1 %475 }
 0x875   :  { %v478_v62 = vadd.f32 %v476_v61, %v468_v60 }
 0x877   :  { %963 = vtanh.f32 %v478_v62 }
 0x87d   :  { %v964_v63 = vpop.eup %963 }
 0x87e   :  { %481 = vrot.lane.b32.xlu2 %v964_v63, %s1102_s4 }
 0x8d8   :  { %v482_v0 = vpop.permute.xlu2 %481 }
 0x8d9   :  { %v484_v1 = vmul.f32 %v482_v0, %v465_v58 }
 0x8db   :  { %486 = vrot.lane.b32.xlu0 %v484_v1, %s1103_s3 }
 0x94d   :  { %v487_v2 = vpop.permute.xlu0 %486 }
 0x94e   :  { %903 = vmatmul.msk.f32.vlgmr.msra.gmra.mxu0 %vm221_vm7, %v487_v2  ;;  %904 = vmatmul.msk.f32.vlgmr.msra.gmra.mxu1 %vm221_vm7, %v487_v2 }
 0x94f   :  { %858 = vmatpush.msra.mxu0 %v1216_v34 }
 0x951   :  { %859 = vmatpush.msra.mxu0 %v1228_v36 }
 0x953   :  { %860 = vmatpush.msra.mxu0 %v1238_v38 }
 0x955   :  { %861 = vmatpush.msra.mxu0 %v1252_v40 }
 0x9cb   :  { %v533_v3 = vpop.f32.mrf.mxu1 }
 0x9cc   :  { %v536_v4 = vadd.f32 %v533_v3, %v1300_v46 }
 0x9ce   :  { %965 = vtanh.f32 %v536_v4  ;;  %v905_v6 = vmul.f32 -1.442695, %v536_v4 }
 0x9d0   :  { %967 = vpow2.f32 %v905_v6 }
 0x9d4   :  { %v966_v5 = vpop.eup %965 }
 0x9d5   :  { %559 = vrot.lane.b32.xlu1 %v966_v5, %s1102_s4 }
 0x9d6   :  { %v968_v7 = vpop.eup %967 }
 0x9d7   :  { %v540_v8 = vadd.f32 1.0, %v968_v7 }
 0x9d9   :  { %969 = vrcp.f32 %v540_v8  ;;  %v552_v38 = vand.u32 2147483648, %v540_v8  ;;  %vm546_vm5 = vweird.f32 %v540_v8  ;;  %v550_v40 = vand.u32 2147483647, %v540_v8 }
 0x9db   :  { %v553_v13 = vor.u32 1.1754944e-38, %v552_v38  ;;  %vm551_vm8 = vcmp.eq.f32.partialorder %v550_v40, 8.507059e+37 }
 0x9df   :  { %v970_v9 = vpop.eup %969 }
 0x9e0   :  { %v542_v34 = vmul.f32 %v970_v9, %v540_v8  ;;  %vm547_vm4 = vweird.f32 %v970_v9 }
 0x9e1   :  { %vm548_vm6 = vmor %vm546_vm5, %vm547_vm4  ;;  %vm336_vm5 = vcmask 130112  }
 0x9e2   :  { %v543_v10 = vsub.f32 1.0, %v542_v34 }
 0x9e4   :  { %v544_v36 = vmul.f32 %v970_v9, %v543_v10 }
 0x9e6   :  { %v545_v11 = vadd.f32 %v970_v9, %v544_v36 }
 0x9e8   :  { %v549_v12 = vsel %vm548_vm6, %v970_v9, %v545_v11  ;;  %vm425_vm6 = vcmask 195712  }
 0x9e9   :  { %v554_v15 = vsel %vm551_vm8, %v553_v13, %v549_v12  ;;  %vm514_vm8 = vcmask 261312  }
 0x9ea   :  { %v557_v17 = vmul.f32 %v554_v15, %v478_v62 }
 0xa47   :  { %v560_v14 = vpop.permute.xlu1 %559 }
 0xa48   :  { %v562_v16 = vmul.f32 %v560_v14, %v554_v15 }
 0xa4a   :  { %564 = vrot.lane.b32.xlu2 %v562_v16, %s1103_s3 }
 0xaa4   :  { %v565_v18 = vpop.permute.xlu2 %564 }
 0xaa5   :  { %v567_v19 = vadd.f32 %v565_v18, %v557_v17 }
 0xaa7   :  { %971 = vtanh.f32 %v567_v19 }
 0xaad   :  { %v972_v20 = vpop.eup %971 }
 0xaae   :  { %570 = vrot.lane.b32.xlu0 %v972_v20, %s1102_s4 }
 0xb20   :  { %v571_v21 = vpop.permute.xlu0 %570 }
 0xb21   :  { %v573_v22 = vmul.f32 %v571_v21, %v554_v15 }
 0xb23   :  { %575 = vrot.lane.b32.xlu1 %v573_v22, %s1103_s3 }
 0xb95   :  { %v576_v23 = vpop.permute.xlu1 %575 }
 0xb96   :  { %906 = vmatmul.msk.f32.vlgmr.msra.gmra.mxu3 %vm221_vm7, %v576_v23  ;;  %907 = vmatmul.msk.f32.vlgmr.msrb.gmra.mxu2 %vm221_vm7, %v576_v23 }
 0xc19   :  { %v622_v24 = vpop.f32.mrf.mxu2 }
 0xc1a   :  { %v625_v25 = vadd.f32 %v622_v24, %v1300_v46 }
 0xc1c   :  { %973 = vtanh.f32 %v625_v25  ;;  %v908_v27 = vmul.f32 -1.442695, %v625_v25 }
 0xc1e   :  { %975 = vpow2.f32 %v908_v27 }
 0xc22   :  { %v974_v26 = vpop.eup %973 }
 0xc23   :  { %648 = vrot.lane.b32.xlu2 %v974_v26, %s1102_s4 }
 0xc24   :  { %v976_v28 = vpop.eup %975 }
 0xc25   :  { %v629_v29 = vadd.f32 1.0, %v976_v28 }
 0xc27   :  { %977 = vrcp.f32 %v629_v29  ;;  %v641_v43 = vand.u32 2147483648, %v629_v29  ;;  %vm635_vm10 = vweird.f32 %v629_v29  ;;  %v639_v44 = vand.u32 2147483647, %v629_v29 }
 0xc29   :  { %v642_v48 = vor.u32 1.1754944e-38, %v641_v43  ;;  %vm640_vm12 = vcmp.eq.f32.partialorder %v639_v44, 8.507059e+37 }
 0xc2d   :  { %v978_v30 = vpop.eup %977 }
 0xc2e   :  { %v631_v31 = vmul.f32 %v978_v30, %v629_v29  ;;  %vm636_vm9 = vweird.f32 %v978_v30  ;;  %v329_v29 = vpop.f32.mrf.mxu0 }
 0xc2f   :  { %vm637_vm11 = vmor %vm635_vm10, %vm636_vm9  ;;  %vm603_vm9 = vcmask 326912   ;;  %vm692_vm10 = vcmask 392512  }
 0xc30   :  { %v632_v32 = vsub.f32 1.0, %v631_v31  ;;  %v330_v31 = vadd.f32 %v1297_v45, %v329_v29 }
 0xc32   :  { %v633_v41 = vmul.f32 %v978_v30, %v632_v32 }
 0xc34   :  { %v634_v42 = vadd.f32 %v978_v30, %v633_v41 }
 0xc36   :  { %v638_v47 = vsel %vm637_vm11, %v978_v30, %v634_v42  ;;  %v418_v30 = vpop.f32.mrf.mxu3  ;;  %vm781_vm11 = vcmask 458112  }
 0xc37   :  { %v643_v35 = vsel %vm640_vm12, %v642_v48, %v638_v47 }
 0xc38   :  { %v646_v50 = vmul.f32 %v643_v35, %v567_v19 }
 0xc3e   :  { %v596_v32 = vpop.f32.mrf.mxu3 }
 0xc3f   :  { %v597_v41 = vadd.f32 %v1297_v45, %v596_v32 }
 0xc7d   :  { %v649_v33 = vpop.permute.xlu2 %648 }
 0xc7e   :  { %v651_v49 = vmul.f32 %v649_v33, %v643_v35  ;;  %v507_v33 = vpop.f32.mrf.mxu0 }
 0xc80   :  { %653 = vrot.lane.b32.xlu0 %v651_v49, %s1103_s3 }
 0xcf2   :  { %v654_v37 = vpop.permute.xlu0 %653 }
 0xcf3   :  { %v656_v51 = vadd.f32 %v654_v37, %v646_v50 }
 0xcf5   :  { %979 = vtanh.f32 %v656_v51 }
 0xcfb   :  { %v980_v52 = vpop.eup %979 }
 0xcfc   :  { %659 = vrot.lane.b32.xlu1 %v980_v52, %s1102_s4 }
 0xd6e   :  { %v660_v53 = vpop.permute.xlu1 %659 }
 0xd6f   :  { %v662_v39 = vmul.f32 %v660_v53, %v643_v35  ;;  %v419_v35 = vadd.f32 %v1297_v45, %v418_v30  ;;  %v508_v53 = vadd.f32 %v1297_v45, %v507_v33 }
 0xd71   :  { %664 = vrot.lane.b32.xlu2 %v662_v39, %s1103_s3 }
 0xdcb   :  { %v665_v54 = vpop.permute.xlu2 %664 }
 0xdcc   :  { %909 = vmatmul.msk.f32.vlgmr.msrb.gmra.mxu0 %vm221_vm7, %v665_v54  ;;  %910 = vmatmul.msk.f32.vlgmr.msrb.gmra.mxu1 %vm221_vm7, %v665_v54 }
 0xe49   :  { %v711_v55 = vpop.f32.mrf.mxu1  ;;  %v685_v49 = vpop.f32.mrf.mxu0 }
 0xe4a   :  { %v714_v56 = vadd.f32 %v711_v55, %v1300_v46  ;;  %v686_v50 = vadd.f32 %v1297_v45, %v685_v49 }
 0xe4c   :  { %981 = vtanh.f32 %v714_v56  ;;  %v911_v58 = vmul.f32 -1.442695, %v714_v56 }
 0xe4e   :  { %983 = vpow2.f32 %v911_v58 }
 0xe52   :  { %v982_v57 = vpop.eup %981 }
 0xe53   :  { %737 = vrot.lane.b32.xlu0 %v982_v57, %s1102_s4 }
 0xe54   :  { %v984_v59 = vpop.eup %983 }
 0xe55   :  { %v718_v60 = vadd.f32 1.0, %v984_v59 }
 0xe57   :  { %985 = vrcp.f32 %v718_v60  ;;  %v730_v2 = vand.u32 2147483648, %v718_v60  ;;  %vm724_vm14 = vweird.f32 %v718_v60  ;;  %v728_v3 = vand.u32 2147483647, %v718_v60 }
 0xe59   :  { %v731_v5 = vor.u32 1.1754944e-38, %v730_v2  ;;  %vm729_vm0 = vcmp.eq.f32.partialorder %v728_v3, 8.507059e+37 }
 0xe5d   :  { %v986_v61 = vpop.eup %985 }
 0xe5e   :  { %v720_v62 = vmul.f32 %v986_v61, %v718_v60  ;;  %vm725_vm13 = vweird.f32 %v986_v61 }
 0xe5f   :  { %vm726_vm15 = vmor %vm724_vm14, %vm725_vm13 }
 0xe60   :  { %v721_v63 = vsub.f32 1.0, %v720_v62 }
 0xe62   :  { %v722_v0 = vmul.f32 %v986_v61, %v721_v63 }
 0xe64   :  { %v723_v1 = vadd.f32 %v986_v61, %v722_v0 }
 0xe66   :  { %v727_v4 = vsel %vm726_vm15, %v986_v61, %v723_v1 }
 0xe67   :  { %v732_v7 = vsel %vm729_vm0, %v731_v5, %v727_v4 }
 0xe68   :  { %v735_v9 = vmul.f32 %v732_v7, %v656_v51 }
 0xec5   :  { %v738_v6 = vpop.permute.xlu0 %737 }
 0xec6   :  { %v740_v8 = vmul.f32 %v738_v6, %v732_v7 }
 0xec8   :  { %742 = vrot.lane.b32.xlu1 %v740_v8, %s1103_s3 }
 0xf3a   :  { %v743_v34 = vpop.permute.xlu1 %742 }
 0xf3b   :  { %v745_v10 = vadd.f32 %v743_v34, %v735_v9 }
 0xf3d   :  { %987 = vtanh.f32 %v745_v10 }
 0xf43   :  { %v988_v36 = vpop.eup %987 }
 0xf44   :  { %748 = vrot.lane.b32.xlu2 %v988_v36, %s1102_s4 }
 0xf9e   :  { %v749_v11 = vpop.permute.xlu2 %748 }
 0xf9f   :  { %v751_v38 = vmul.f32 %v749_v11, %v732_v7 }
 0xfa1   :  { %753 = vrot.lane.b32.xlu0 %v751_v38, %s1103_s3 }
0x1013   :  { %v754_v40 = vpop.permute.xlu0 %753 }
0x1014   :  { %912 = vmatmul.msk.f32.vlgmr.msrb.gmra.mxu3 %vm221_vm7, %v754_v40  ;;  %913 = vmatmul.msk.f32.vlgmr.msra.gmra.mxu2 %vm221_vm7, %v754_v40 }
0x1097   :  { %v800_v12 = vpop.f32.mrf.mxu2  ;;  %v774_v39 = vpop.f32.mrf.mxu3 }
0x1098   :  { %v803_v13 = vadd.f32 %v800_v12, %v1300_v46  ;;  %v775_v54 = vadd.f32 %v1297_v45, %v774_v39 }
0x109a   :  { %989 = vtanh.f32 %v803_v13  ;;  %v914_v15 = vmul.f32 -1.442695, %v803_v13 }
0x109c   :  { %991 = vpow2.f32 %v914_v15 }
0x10a0   :  { %v990_v14 = vpop.eup %989 }
0x10a1   :  { %826 = vrot.lane.b32.xlu1 %v990_v14, %s1102_s4 }
0x10a2   :  { %v992_v16 = vpop.eup %991 }
0x10a3   :  { %v807_v17 = vadd.f32 1.0, %v992_v16 }
0x10a5   :  { %993 = vrcp.f32 %v807_v17  ;;  %v819_v23 = vand.u32 2147483648, %v807_v17  ;;  %vm813_vm2 = vweird.f32 %v807_v17  ;;  %v817_v24 = vand.u32 2147483647, %v807_v17 }
0x10a7   :  { %v820_v25 = vor.u32 1.1754944e-38, %v819_v23  ;;  %vm818_vm4 = vcmp.eq.f32.partialorder %v817_v24, 8.507059e+37 }
0x10ab   :  { %v994_v18 = vpop.eup %993 }
0x10ac   :  { %v809_v19 = vmul.f32 %v994_v18, %v807_v17  ;;  %vm814_vm1 = vweird.f32 %v994_v18 }
0x10ad   :  { %vm815_vm3 = vmor %vm813_vm2, %vm814_vm1 }
0x10ae   :  { %v810_v20 = vsub.f32 1.0, %v809_v19 }
0x10b0   :  { %v811_v21 = vmul.f32 %v994_v18, %v810_v20 }
0x10b2   :  { %v812_v22 = vadd.f32 %v994_v18, %v811_v21 }
0x10b4   :  { %v816_v46 = vsel %vm815_vm3, %v994_v18, %v812_v22 }
0x10b5   :  { %v821_v27 = vsel %vm818_vm4, %v820_v25, %v816_v46 }
0x10b6   :  { %v824_v42 = vmul.f32 %v821_v27, %v745_v10 }
0x1113   :  { %v827_v26 = vpop.permute.xlu1 %826 }
0x1114   :  { %v829_v28 = vmul.f32 %v827_v26, %v821_v27 }
0x1116   :  { %831 = vrot.lane.b32.xlu2 %v829_v28, %s1103_s3 }
0x111e   :  { %333 = vrot.lane.b32.xlu2 %v330_v31, %s1105_s8 }
0x1126   :  { %600 = vrot.lane.b32.xlu2 %v597_v41, %s1103_s3 }
0x1170   :  { %v832_v43 = vpop.permute.xlu2 %831 }
0x1171   :  { %v834_v44 = vadd.f32 %v832_v43, %v824_v42 }
0x1173   :  { %995 = vtanh.f32 %v834_v44 }
0x1178   :  { %v334_v47 = vpop.permute.xlu2 %333 }
0x1179   :  { %v996_v48 = vpop.eup %995  ;;  %337 = vst.msk [vmem:[#allocation8] sm:$0xff] %vm336_vm5, %v334_v47 }
0x117a   :  { %837 = vrot.lane.b32.xlu0 %v996_v48, %s1102_s4  ;;  %s877_s4 = sshll.u32 %s1111_s22, 4  ;;  %s878_s4 = int_to_ptr.vmem [resolvable:$true] %s877_s4 }
0x1180   :  { %v601_v57 = vpop.permute.xlu2 %600 }
0x1182   :  { %422 = vrot.lane.b32.xlu0 %v419_v35, %s1106_s10 }
0x118a   :  { %689 = vrot.lane.b32.xlu0 %v686_v50, %s1107_s19 }
0x11ec   :  { %v838_v37 = vpop.permute.xlu0 %837 }
0x11ed   :  { %v840_v51 = vmul.f32 %v838_v37, %v821_v27 }
0x11ef   :  { %842 = vrot.lane.b32.xlu1 %v840_v51, %s1103_s3 }
0x11f4   :  { %v423_v52 = vpop.permute.xlu0 %422 }
0x11f5   :  { %426 = vst.msk [vmem:[#allocation8] sm:$0xff] %vm425_vm6, %v423_v52 }
0x11f7   :  { %511 = vrot.lane.b32.xlu1 %v508_v53, %s1108_s2 }
0x11fc   :  { %v690_v58 = vpop.permute.xlu0 %689 }
0x11ff   :  { %778 = vrot.lane.b32.xlu1 %v775_v54, %s1109_s20 }
0x1261   :  { %v843_v55 = vpop.permute.xlu1 %842 }
0x1262   :  { %915 = vmatmul.msk.f32.vlgmr.msra.gmra.mxu0 %vm221_vm7, %v843_v55  ;;  %vm870_vm7 = vcmask 523712  }
0x1269   :  { %v512_v56 = vpop.permute.xlu1 %511 }
0x126a   :  { %515 = vst.msk [vmem:[#allocation8] sm:$0xff] %vm514_vm8, %v512_v56 }
0x126b   :  { %604 = vst.msk [vmem:[#allocation8] sm:$0xff] %vm603_vm9, %v601_v57 }
0x126c   :  { %693 = vst.msk [vmem:[#allocation8] sm:$0xff] %vm692_vm10, %v690_v58 }
0x1271   :  { %v779_v59 = vpop.permute.xlu1 %778 }
0x1272   :  { %782 = vst.msk [vmem:[#allocation8] sm:$0xff] %vm781_vm11, %v779_v59 }
0x12df   :  { %v863_v60 = vpop.f32.mrf.mxu0 }
0x12e0   :  { %v864_v61 = vadd.f32 %v1297_v45, %v863_v60 }
0x12e2   :  { %867 = vrot.lane.b32.xlu2 %v864_v61, %s1110_s21 }
0x133c   :  { %v868_v62 = vpop.permute.xlu2 %867 }
0x133d   :  { %871 = vst.msk [vmem:[#allocation8] sm:$0xff] %vm870_vm7, %v868_v62 }
0x133e   :  { %882 = dma.vmem_to_hbm [thread:$0]  %s878_s4, 128, %s880_s23, [#allocation4]  }
0x133f   :  { %1097 = dma.done.wait [#allocation4], 128  }
0x1340   :  { %1098 = vsyncadd [#allocation4], 4294967168 }
0x1341   :  { %887 = vsyncpa [#allocation3], 1 }
0x1342   :  { %888 = vsyncpa [#allocation6], 1 }
0x1343   :  { %889 = vsyncpa [#allocation4], 1 }

</bundles_post_ra>
